<compile_context>
chip_gen: v7x
topology: tpu7x:2x2x1
jax: 0.10.0
libtpu: 0.0.40
codegen_flags: <defaults>
</compile_context>

<pallas_src>
import functools

import jax
import jax.numpy as jnp
from jax.experimental import pallas as pl
from jax.experimental.pallas import tpu as pltpu


# ---------------------------------------------------------------------------
# Pallas kernels
# ---------------------------------------------------------------------------
def _layernorm_kernel(x_ref, w_ref, b_ref, o_ref, *, eps):
    # x_ref: (tile_rows, H) VMEM tile; w_ref / b_ref: (1, H) f32 (pre-cast in wrapper)
    x = x_ref[...].astype(jnp.float32)
    # Single-pass statistics: both reductions consume the same pass over x
    # (no reduce -> subtract -> reduce dependency chain).
    mean = jnp.mean(x, axis=-1, keepdims=True)
    mean_sq = jnp.mean(x * x, axis=-1, keepdims=True)
    var = mean_sq - mean * mean                 # biased variance (torch LayerNorm)
    inv = jax.lax.rsqrt(var + eps)              # (T, 1) column -> cheap
    y = (x - mean) * inv * w_ref[...] + b_ref[...]
    o_ref[...] = y.astype(o_ref.dtype)


def _rmsnorm_kernel(x_ref, w_ref, o_ref, *, eps):
    # Matches the PyTorch RMSNorm exactly: eps is added AFTER the sqrt.
    x = x_ref[...].astype(jnp.float32)
    rms = jnp.sqrt(jnp.mean(x * x, axis=-1, keepdims=True))    # (T, 1)
    # Reciprocal of the narrow (T, 1) column uses the EUP slot; the full-width
    # op is then a multiply instead of an expensive per-element divide.
    inv = pl.reciprocal(rms + eps, approx=False)
    o_ref[...] = (x * inv * w_ref[...]).astype(o_ref.dtype)


# ---------------------------------------------------------------------------
# Tile-size / VMEM selection (per-generation, dtype-aware)
# ---------------------------------------------------------------------------
def _sublane_multiple(dtype):
    # f32 -> 8, bf16/f16 -> 16, int8/fp8 -> 32 (sub-32-bit dtypes pack sublanes).
    itemsize = jnp.dtype(dtype).itemsize
    return max(8, 32 // max(1, itemsize))


def _vmem_limit_bytes():
    # Per-generation physical VMEM: v5e/v6e 128 MiB, v7x 64 MiB.
    # Leave headroom for compiler scratch; cap at 112 MiB.
    try:
        cap = int(pltpu.get_tpu_info().vmem_capacity_bytes)
    except Exception:
        cap = 64 * 1024 * 1024          # conservative (v7x-sized) fallback
    return min((cap * 3) // 4, 112 * 1024 * 1024)


def _pick_tile_rows(rows, hidden, dtype, vmem_limit):
    sub = _sublane_multiple(dtype)
    itemsize = jnp.dtype(dtype).itemsize
    row_bytes = hidden * itemsize
    # Pipelined footprint ~= 2 buffers x (input tile + output tile), so keep
    # each tile buffer under ~1/8 of the scoped VMEM limit.
    per_tile_budget = max(vmem_limit // 8, sub * row_bytes)
    max_by_vmem = max(sub, per_tile_budget // row_bytes)
    # Keep the grid >= ~4 steps so the (parallel) row axis can still shard
    # across v7x's two TensorCores and the pipeline has work to overlap.
    rows_rounded = ((rows + sub - 1) // sub) * sub
    max_by_grid = max(sub, pl.cdiv(rows_rounded, 4))
    tile = min(max_by_vmem, max_by_grid, rows_rounded)
    tile = max(sub, (tile // sub) * sub)
    return tile


# ---------------------------------------------------------------------------
# Wrapper
# ---------------------------------------------------------------------------
def norm_forward(x, weight, bias=None, *, norm_type="layernorm", eps=1e-5):
    """Pallas implementation of Norm.forward.

    x      : (..., hidden)
    weight : (hidden,)  (LayerNorm weight or RMSNorm scale)
    bias   : (hidden,)  (LayerNorm only)
    """
    norm_type = norm_type.lower()
    orig_shape = x.shape
    hidden = orig_shape[-1]
    rows = 1
    for d in orig_shape[:-1]:
        rows *= d
    x2d = x.reshape(rows, hidden)

    vmem_limit = _vmem_limit_bytes()
    tile_rows = _pick_tile_rows(rows, hidden, x.dtype, vmem_limit)

    # Pad the row axis up to a tile multiple so every shape takes the
    # pipelined path (no giant single-block fallback / VMEM blowup).
    rows_padded = pl.cdiv(rows, tile_rows) * tile_rows
    if rows_padded != rows:
        x2d = jnp.pad(x2d, ((0, rows_padded - rows), (0, 0)))
    grid = (rows_padded // tile_rows,)

    # TODO(synk): for hidden < 128 (or non-multiples of 128), fold groups of
    # rows into the lane dimension so stores are unmasked full-width vst.

    row_spec = pl.BlockSpec((tile_rows, hidden), lambda i: (i, 0))
    param_spec = pl.BlockSpec((1, hidden), lambda i: (0, 0))
    w2d = weight.reshape(1, hidden).astype(jnp.float32)   # hoist f32 cast

    compiler_params = pltpu.CompilerParams(
        dimension_semantics=("parallel",),
        vmem_limit_bytes=int(vmem_limit),
    )

    if norm_type == "layernorm":
        if bias is None:
            raise ValueError("layernorm requires a bias")
        b2d = bias.reshape(1, hidden).astype(jnp.float32)
        out = pl.pallas_call(
            functools.partial(_layernorm_kernel, eps=eps),
            out_shape=jax.ShapeDtypeStruct((rows_padded, hidden), x.dtype),
            grid_spec=pl.GridSpec(
                grid=grid,
                in_specs=[row_spec, param_spec, param_spec],
                out_specs=row_spec,
            ),
            compiler_params=compiler_params,
        )(x2d, w2d, b2d)
    elif norm_type == "rmsnorm":
        out = pl.pallas_call(
            functools.partial(_rmsnorm_kernel, eps=eps),
            out_shape=jax.ShapeDtypeStruct((rows_padded, hidden), x.dtype),
            grid_spec=pl.GridSpec(
                grid=grid,
                in_specs=[row_spec, param_spec],
                out_specs=row_spec,
            ),
            compiler_params=compiler_params,
        )(x2d, w2d)
    else:
        raise ValueError(f"Unsupported norm type: {norm_type}")

    if rows_padded != rows:
        out = out[:rows]
    return out.reshape(orig_shape)


# ---------------------------------------------------------------------------
# Pure-JAX references (for verification only)
# ---------------------------------------------------------------------------
def _layernorm_ref(x, w, b, eps=1e-5):
    x32 = x.astype(jnp.float32)
    mean = jnp.mean(x32, axis=-1, keepdims=True)
    var = jnp.mean((x32 - mean) ** 2, axis=-1, keepdims=True)
    return ((x32 - mean) * jax.lax.rsqrt(var + eps) * w + b).astype(x.dtype)


def _rmsnorm_ref(x, w, eps=1e-5):
    x32 = x.astype(jnp.float32)
    rms = jnp.sqrt(jnp.mean(x32 * x32, axis=-1, keepdims=True))
    return (w * (x32 / (rms + eps))).astype(x.dtype)


if __name__ == "__main__":
    batch, seq, hidden = 2, 8, 32
    key = jax.random.PRNGKey(0)
    kx, kw, kb, ks, kx2 = jax.random.split(key, 5)
    x = jax.random.normal(kx, (batch, seq, hidden), dtype=jnp.float32)

    ln_weight = 1.0 + 0.1 * jax.random.normal(kw, (hidden,), dtype=jnp.float32)
    ln_bias = 0.1 * jax.random.normal(kb, (hidden,), dtype=jnp.float32)
    rms_scale = 1.0 + 0.1 * jax.random.normal(ks, (hidden,), dtype=jnp.float32)

    # Norm(hidden, norm_type='layernorm')  -- the module's default
    y_ln = norm_forward(x, ln_weight, ln_bias, norm_type="layernorm", eps=1e-5)
    y_ln = jax.block_until_ready(y_ln)

    # Norm(hidden, norm_type='rmsnorm')
    y_rms = norm_forward(x, rms_scale, norm_type="rmsnorm", eps=1e-5)
    y_rms = jax.block_until_ready(y_rms)

    # Non-multiple-of-8 row count exercises the padded pipelined path.
    x_odd = jax.random.normal(kx2, (2, 7, hidden), dtype=jnp.float32)
    y_odd = norm_forward(x_odd, ln_weight, ln_bias, norm_type="layernorm", eps=1e-5)
    y_odd = jax.block_until_ready(y_odd)

    ok_ln = jnp.allclose(y_ln, _layernorm_ref(x, ln_weight, ln_bias), atol=1e-5, rtol=1e-5)
    ok_rms = jnp.allclose(y_rms, _rmsnorm_ref(x, rms_scale), atol=1e-5, rtol=1e-5)
    ok_odd = jnp.allclose(y_odd, _layernorm_ref(x_odd, ln_weight, ln_bias), atol=1e-5, rtol=1e-5)
    assert bool(ok_ln), "LayerNorm kernel mismatch"
    assert bool(ok_rms), "RMSNorm kernel mismatch"
    assert bool(ok_odd), "LayerNorm (padded rows) kernel mismatch"

    print("KERNEL_OK")
</pallas_src>

<mosaic_0001>
module attributes {stable_mosaic.version = 11 : i64} {
  func.func @_layernorm_kernel(%arg0: i32, %arg1: memref<8x32xf32, #tpu.memory_space<vmem>>, %arg2: memref<1x32xf32, #tpu.memory_space<vmem>>, %arg3: memref<1x32xf32, #tpu.memory_space<vmem>>, %arg4: memref<8x32xf32, #tpu.memory_space<vmem>>) attributes {dimension_semantics = [#tpu.dimension_semantics<parallel>], iteration_bounds = array<i64: 2>, scalar_prefetch = 0 : i64, scratch_operands = 0 : i64, tpu.core_type = #tpu.core_type<tc>, window_params = [{transform_indices = @transform_0, window_bounds = array<i64: 8, 32>}, {pipeline_mode = #tpu.pipeline_mode<synchronous>, transform_indices = @transform_1, window_bounds = array<i64: 1, 32>}, {pipeline_mode = #tpu.pipeline_mode<synchronous>, transform_indices = @transform_2, window_bounds = array<i64: 1, 32>}, {transform_indices = @transform_3, window_bounds = array<i64: 8, 32>}]} {
    %c0 = arith.constant 0 : index
    %c0_0 = arith.constant 0 : index
    %0 = vector.load %arg1[%c0, %c0_0] : memref<8x32xf32, #tpu.memory_space<vmem>>, vector<8x32xf32>
    %cst = arith.constant dense<0.000000e+00> : vector<8xf32>
    %1 = vector.multi_reduction <add>, %0, %cst [1] : vector<8x32xf32> to vector<8xf32>
    %2 = vector.shape_cast %1 : vector<8xf32> to vector<8x1xf32>
    %cst_1 = arith.constant 3.200000e+01 : f32
    %3 = vector.broadcast %cst_1 : f32 to vector<8x1xf32>
    %4 = arith.divf %2, %3 : vector<8x1xf32>
    %5 = arith.mulf %0, %0 : vector<8x32xf32>
    %cst_2 = arith.constant dense<0.000000e+00> : vector<8xf32>
    %6 = vector.multi_reduction <add>, %5, %cst_2 [1] : vector<8x32xf32> to vector<8xf32>
    %7 = vector.shape_cast %6 : vector<8xf32> to vector<8x1xf32>
    %cst_3 = arith.constant 3.200000e+01 : f32
    %8 = vector.broadcast %cst_3 : f32 to vector<8x1xf32>
    %9 = arith.divf %7, %8 : vector<8x1xf32>
    %10 = arith.mulf %4, %4 : vector<8x1xf32>
    %11 = arith.subf %9, %10 : vector<8x1xf32>
    %cst_4 = arith.constant 9.99999974E-6 : f32
    %12 = vector.broadcast %cst_4 : f32 to vector<8x1xf32>
    %13 = arith.addf %11, %12 : vector<8x1xf32>
    %14 = math.rsqrt %13 : vector<8x1xf32>
    %15 = vector.broadcast %4 : vector<8x1xf32> to vector<8x32xf32>
    %16 = arith.subf %0, %15 : vector<8x32xf32>
    %17 = vector.broadcast %14 : vector<8x1xf32> to vector<8x32xf32>
    %18 = arith.mulf %16, %17 : vector<8x32xf32>
    %c0_5 = arith.constant 0 : index
    %c0_6 = arith.constant 0 : index
    %19 = vector.load %arg2[%c0_5, %c0_6] : memref<1x32xf32, #tpu.memory_space<vmem>>, vector<1x32xf32>
    %20 = vector.broadcast %19 : vector<1x32xf32> to vector<8x32xf32>
    %21 = arith.mulf %18, %20 : vector<8x32xf32>
    %c0_7 = arith.constant 0 : index
    %c0_8 = arith.constant 0 : index
    %22 = vector.load %arg3[%c0_7, %c0_8] : memref<1x32xf32, #tpu.memory_space<vmem>>, vector<1x32xf32>
    %23 = vector.broadcast %22 : vector<1x32xf32> to vector<8x32xf32>
    %24 = arith.addf %21, %23 : vector<8x32xf32>
    %c0_9 = arith.constant 0 : index
    %c0_10 = arith.constant 0 : index
    %25 = vector.load %arg4[%c0_9, %c0_10] : memref<8x32xf32, #tpu.memory_space<vmem>>, vector<8x32xf32>
    tpu.vector_store %arg4[%c0_9, %c0_10], %24 {strides = array<i32>} : memref<8x32xf32, #tpu.memory_space<vmem>>, vector<8x32xf32>,
    return
  }
  func.func @transform_0(%arg0: i32) -> (i32, i32) {
    %c0_i32 = arith.constant 0 : i32
    %c0_i32_0 = arith.constant 0 : i32
    return %arg0, %c0_i32 : i32, i32
  }
  func.func @transform_1(%arg0: i32) -> (i32, i32) {
    %c0_i32 = arith.constant 0 : i32
    %c0_i32_0 = arith.constant 0 : i32
    %c0_i32_1 = arith.constant 0 : i32
    return %c0_i32, %c0_i32_0 : i32, i32
  }
  func.func @transform_2(%arg0: i32) -> (i32, i32) {
    %c0_i32 = arith.constant 0 : i32
    %c0_i32_0 = arith.constant 0 : i32
    %c0_i32_1 = arith.constant 0 : i32
    return %c0_i32, %c0_i32_0 : i32, i32
  }
  func.func @transform_3(%arg0: i32) -> (i32, i32) {
    %c0_i32 = arith.constant 0 : i32
    %c0_i32_0 = arith.constant 0 : i32
    return %arg0, %c0_i32 : i32, i32
  }
}

</mosaic_0001>

<bundles_post_ra>
// kernel: tpu_custom_call.1
= control target key start
LH: loop header
LB: loop body
LE: loop exit
PB: predicated region body
PF: predicated region fallthrough
CT: control target
= control target key end

     0   :  { %8 = vsyncpa [#allocation3], 0  ;;  %s657_s0 = inlined_call_operand.hbm [shape: f32[16,32], index: 0, kind: input, shape index: {}]   ;;  %s658_s1 = inlined_call_operand.vmem [shape: f32[1,32], index: 1, kind: input, shape index: {}]   ;;  %s659_s2 = inlined_call_operand.vmem [shape: f32[1,32], index: 2, kind: input, shape index: {}]   ;;  %s660_s3 = inlined_call_operand.hbm [shape: f32[16,32], index: 3, kind: output, shape index: {}]  }
   0x1   :  { %10 = vsyncpa [#allocation3 + $0x1], 0 }
   0x2   :  { %11 = vsyncpa [#allocation4], 0 }
   0x3   :  { %13 = vsyncpa [#allocation4 + $0x1], 0  ;;  %s487_s12 = smov 0   ;;  %s489_s13 = smov 0  }
   0x4   :  { %s491_s14 = smov 0   ;;  %s493_s15 = smov 0  }
   0x5 LB: > { %s508_s16 = sadd.s32 4294967295, %s463_s15   ;;  %s305_s17 = sadd.s32 4294967294, %s463_s15   ;;  %s463_s15 = sphi %s493_s15, %s675_s15   ;;  %s459_s14 = sphi %s491_s14, %s674_s14   ;;  %s455_s13 = sphi %s489_s13, %s673_s13   ;;  %s451_s12 = sphi %s487_s12, %s672_s12  }
   0x6   : > { %s512_s18 = sadd.s32 1, %s463_s15   ;;  %s26_s19 = sadd.s32 1, %s459_s14 }
   0x7   : > { %s23_s20 = ssub.s32 %s463_s15, %s512_s18  ;;  %p33_p0 = scmp.ne.s32.totalorder %s459_s14, %s455_s13 }
   0x8   : > { %p24_p1 = scmp.eq.s32.totalorder %s23_s20, 0  ;;  %p34_p2 = scmp.eq.s32.totalorder %s463_s15, 0 }
   0x9   : > { %p39_p3 = scmp.ne.s32.totalorder %s455_s13, %s451_s12  ;;  %p40_p4 = scmp.eq.s32.totalorder %s508_s16, 0 }
   0xa   : > { %s524_s21 = scalar_select %p24_p1, %s459_s14, %s26_s19  }
   0xb   : > { %p526_p5 = por %p34_p2, %p33_p0  ;;  %p530_p6 = por %p40_p4, %p39_p3 }
   0xc   : > { %p105_p7 = scmp.eq.s32.totalorder %s508_s16, 1  ;;  %p111_p8 = scmp.eq.s32.totalorder %s305_s17, 1 }
   0xd   : > { %p331_p10 = scmp.lt.s32.totalorder %s463_s15, 2  ;;  %s137_s26 = sand.u32 1, %s459_s14  }
   0xe   : > { %p537_p11 = por %p105_p7, %p33_p0  ;;  %p541_p12 = por %p111_p8, %p39_p3 }
   0xf   : > { %s309_s27 = sshll.u32 %s463_s15, 7  ;;  %s308_s28 = sshll.u32 %s137_s26, 3 }
  0x10   : > { %s664_s24 = scalar_select %p537_p11, 1, 0 }
  0x11   : > { %s665_s25 = scalar_select %p541_p12, 1, 0 }
  0x12   : > { %s550_s4 = scalar_lea.hbm %s657_s0, %s309_s27  ;;  %s141_s5 = scalar_lea.vmem [#allocation2], %s308_s28 }
  0x13   : > { %s148_s6 = sshll.u32 %s141_s5, 4  ;;  %p554_p13 = pnand %p331_p10, %p526_p5  ;;  %s558_s6 = int_to_ptr.vmem [resolvable:$true] %s148_s6 }
  0x14   : > { %s138_s8 = scalar_lea.sflag [#allocation3], %s137_s26  ;;  %s367_s9 = scalar_lea.hbm %s550_s4, 128 }
  0x15   : > { %p368_p2 = scmp.ne.s32.totalorder %s550_s4, %s367_s9  ;;  %p369_p3 = pneg %p554_p13 }
  0x16   : > { %s372_s17 = scalar_lea.hbm %s657_s0, 256  ;;  %p373_p5 = scmp.lt.u32.totalorder %s550_s4, %s657_s0 }
  0x17   : > { %p370_p4 = pnand %p369_p3, %p368_p2  ;;  %p374_p8 = scmp.lt.u32.totalorder %s372_s17, %s367_s9 }
  0x18   : > { %p376_p9 = scmp.lt.u32.totalorder %s367_s9, %s550_s4 }
  0x19   : > { %p371_p7 = pneg %p370_p4  ;;  %p375_p10 = por %p374_p8, %p373_p5 }
  0x1b   : > { %p377_p0 = por %p376_p9, %p375_p10 }
  0x1d   : > { %p378_p1 = pnand %p377_p0, %p371_p7 }
  0x1f   : > { %381 = shalt.err (!%p378_p1)
}
  0x20   : > { %s382_s22 = scalar_lea.vmem %s558_s6, 128  ;;  %s465_s26 = smov [#allocation2]  }
  0x21   : > { %p383_p2 = scmp.ne.s32.totalorder %s558_s6, %s382_s22  ;;  %s387_s27 = sshll.u32 %s465_s26, 4  ;;  %s388_s27 = int_to_ptr.vmem [resolvable:$false] %s387_s27 }
  0x22   : > { %s389_s28 = scalar_lea.vmem %s388_s27, 256  ;;  %p390_p11 = scmp.lt.s32.totalorder %s558_s6, %s388_s27 }
  0x23   : > { %p385_p4 = pnand %p383_p2, %p369_p3  ;;  %p391_p5 = scmp.lt.s32.totalorder %s389_s28, %s382_s22 }
  0x25   : > { %p386_p12 = pneg %p385_p4  ;;  %p392_p8 = por %p391_p5, %p390_p11 }
  0x27   : > { %p393_p9 = pnand %p392_p8, %p386_p12 }
  0x29   : > { %396 = shalt.err (!%p393_p9)
}
  0x2a   : > { %326 = dma.hbm_to_vmem [thread:$0]  (!%p554_p13), %s550_s4, 128, %s558_s6, %s138_s8  }
  0x2b   : > { %p667_p0 = scmp.lt.s32.totalorder %s463_s15, 3  ;;  %p668_p1 = scmp.ge.s32.totalorder %s463_s15, 1 }
  0x2d   : > { %p154_p3 = pnand %p668_p1, %p667_p0 }
  0x2e   : > { %s592_s29 = sand.u32 (!%p154_p3), 1, %s455_s13  }
  0x2f   : > { %157 = sbr.rel (%p154_p3) target bundleno = 240 (0xf0), region = 32  ;;  %s311_s30 = sshll.u32 (!%p154_p3), %s592_s29, 3 }
  0x30   : > { %s160_s5 = scalar_lea.sflag (!%p154_p3), [#allocation3], %s592_s29  ;;  %s163_s9 = scalar_lea.vmem (!%p154_p3), [#allocation2], %s311_s30 }
  0x36   : > { %442 = dma.done.wait (%p530_p6), %s160_s5, 128  }
  0x37   : > { %444 = vsyncadd (%p530_p6), %s160_s5, 4294967168  ;;  %vm187_vm0 = vcmask 261120   ;;  %v186_v0 = vld [vmem:[%s163_s9] sm:$0xff]  ;;  %s316_s8 = sshll.u32 %s508_s16, 7  ;;  %s185_s10 = scalar_lea.vmem [#allocation5], %s311_s30 }
  0x38   : > { %v188_v1 = vsel %vm187_vm0, %v186_v0, 0.0  ;;  %v193_v2 = vmul.f32 %v186_v0, %v186_v0  ;;  %v313_v13 = vld [vmem:[%s658_s1] ss:$0 sm:$0xff]  ;;  %s235_s11 = sshll.u32 %s185_s10, 4  ;;  %s612_s20 = scalar_lea.hbm %s660_s3, %s316_s8  ;;  %s614_s11 = int_to_ptr.vmem [resolvable:$true] %s235_s11 }
  0x39   : > { %189 = vadd.xlane.f32.xlu0 %v188_v1  ;;  %v314_v15 = vld [vmem:[%s659_s2] ss:$0 sm:$0xff]  ;;  %s222_s22 = scalar_lea.sflag [#allocation4], %s592_s29  ;;  %s397_s26 = scalar_lea.vmem %s614_s11, 128 }
  0x3a   : > { %v194_v3 = vsel %vm187_vm0, %v193_v2, 0.0  ;;  %p398_p6 = scmp.ne.s32.totalorder %s614_s11, %s397_s26  ;;  %p669_p11 = scmp.ne.s32.totalorder %s664_s24, 0 }
  0x3b   : > { %s466_s16 = smov [#allocation5]  }
  0x3c   : > { %p399_p12 = pnand %p398_p6, %p669_p11  ;;  %s401_s27 = sshll.u32 %s466_s16, 4  ;;  %s402_s27 = int_to_ptr.vmem [resolvable:$false] %s401_s27 }
  0x3d   : > { %195 = vadd.xlane.f32.xlu0 %v194_v3  ;;  %s403_s28 = scalar_lea.vmem %s402_s27, 256  ;;  %p404_p7 = scmp.lt.s32.totalorder %s614_s11, %s402_s27 }
  0x3e   : > { %p400_p13 = pneg %p399_p12  ;;  %p405_p10 = scmp.lt.s32.totalorder %s403_s28, %s397_s26 }
  0x40   : > { %p406_p2 = por %p405_p10, %p404_p7 }
  0x42   : > { %p407_p4 = pnand %p406_p2, %p400_p13 }
  0xc6   : > { %v190_v4 = vpop.xlane.xlu0 %189 }
  0xc7   : > { %v192_v5 = vmul.f32 0.03125, %v190_v4 }
  0xc9   : > { %v198_v7 = vmul.f32 %v192_v5, %v192_v5  ;;  %v202_v11 = vsub.f32 %v186_v0, %v192_v5 }
  0xca   : > { %v196_v6 = vpop.xlane.xlu0 %195 }
  0xcb   : > { %v197_v8 = vmul.f32 0.03125, %v196_v6 }
  0xcd   : > { %v199_v9 = vsub.f32 %v197_v8, %v198_v7 }
  0xcf   : > { %v200_v10 = vadd.f32 1e-05, %v199_v9 }
  0xd1   : > { %365 = vrsqrt.f32 %v200_v10 }
  0xdb   : > { %v366_v12 = vpop.eup %365 }
  0xdc   : > { %v203_v14 = vmul.f32 %v366_v12, %v202_v11 }
  0xde   : > { %v211_v16 = vmul.f32 %v313_v13, %v203_v14 }
  0xe0   : > { %v219_v17 = vadd.f32 %v314_v15, %v211_v16 }
  0xe2   : > { %220 = vst.msk [vmem:[%s185_s10] sm:$0xff] %vm187_vm0, %v219_v17 }
  0xe3   : > { %410 = shalt.err (!%p407_p4)
}
  0xe4   : > { %s411_s29 = scalar_lea.hbm %s612_s20, 128  ;;  %s415_s9 = scalar_lea.hbm %s660_s3, 256 }
  0xe5   : > { %p412_p5 = scmp.ne.s32.totalorder %s612_s20, %s411_s29  ;;  %p416_p0 = scmp.lt.u32.totalorder %s612_s20, %s660_s3 }
  0xe6   : > { %p417_p1 = scmp.lt.u32.totalorder %s415_s9, %s411_s29  ;;  %p419_p6 = scmp.lt.u32.totalorder %s411_s29, %s612_s20 }
  0xe7   : > { %p413_p8 = pnand %p412_p5, %p669_p11 }
  0xe8   : > { %p418_p3 = por %p417_p1, %p416_p0 }
  0xe9   : > { %p414_p9 = pneg %p413_p8 }
  0xea   : > { %p420_p12 = por %p419_p6, %p418_p3 }
  0xec   : > { %p421_p13 = pnand %p420_p12, %p414_p9 }
  0xee   : > { %424 = shalt.err (!%p421_p13)
}
  0xef   : > { %321 = dma.vmem_to_hbm [thread:$0]  (%p669_p11), %s614_s11, 128, %s612_s20, %s222_s22  }
  0xf0 PF: > { %s247_s6 = sand.u32 1, %s451_s12   ;;  %p670_p7 = scmp.ne.s32.totalorder %s665_s25, 0 }
  0xf1   : > { %p671_p10 = scmp.ge.s32.totalorder %s463_s15, 2  ;;  %s248_s7 = scalar_lea.sflag [#allocation4], %s247_s6 }
  0xf3   : > { %p328_p2 = pnand %p671_p10, %p670_p7 }
  0xf5   : > { %446 = dma.done.wait (!%p328_p2), %s248_s7, 128  }
  0xf6   : > { %448 = vsyncadd (!%p328_p2), %s248_s7, 4294967168  ;;  %p16_p4 = scmp.ge.s32.totalorder %s512_s18, 4   ;;  %s672_s12 = smov %s455_s13 }
  0xf7   : > { %s673_s13 = smov %s459_s14  ;;  %s674_s14 = smov %s524_s21 }
  0xf8   : > { %s675_s15 = smov %s512_s18  ;;  %18 = sbr.rel (!%p16_p4) target bundleno = 5 (0x5), region = 77 }
  0xff   :  { %253 = vsyncpa [#allocation3], 1 }
 0x100   :  { %255 = vsyncpa [#allocation3 + $0x1], 1 }
 0x101   :  { %256 = vsyncpa [#allocation4], 1 }
 0x102   :  { %258 = vsyncpa [#allocation4 + $0x1], 1 }

</bundles_post_ra>
